<compile_context>
chip_gen: v7x
topology: tpu7x:2x2x1
jax: 0.10.0
libtpu: 0.0.40
codegen_flags: <defaults>
</compile_context>

<pallas_src>
import jax
import jax.numpy as jnp
from jax import lax
from jax.experimental import pallas as pl
from jax.experimental.pallas import tpu as pltpu


_MIB = 1024 * 1024


def _pad_value(dtype):
    # torch.nn.MaxPool2d pads with -inf for floating inputs.
    dtype = jnp.dtype(dtype)
    if jnp.issubdtype(dtype, jnp.floating):
        return jnp.array(-jnp.inf, dtype)
    return jnp.array(jnp.iinfo(dtype).min, dtype)


def _compute_dtype(dtype):
    """In-kernel compute dtype: 32-bit so the roll fast path works for bf16/f16."""
    dtype = jnp.dtype(dtype)
    if jnp.issubdtype(dtype, jnp.floating) and dtype.itemsize <= 4:
        return jnp.dtype(jnp.float32)
    if jnp.issubdtype(dtype, jnp.integer) and dtype.itemsize <= 4:
        return jnp.dtype(jnp.int32)
    return dtype


def _chip_budget():
    """Per-chip (VMEM limit, main-block byte target).  v7x: 64 MiB physical VMEM."""
    cap = None
    try:
        info = pltpu.get_tpu_info()
        cap = int(getattr(info, "vmem_capacity_bytes", 0)) or None
    except Exception:
        cap = None
    if cap is None or cap < 16 * _MIB:
        cap = 64 * _MIB                     # conservative default (v7x-sized)
    if cap <= 64 * _MIB:                    # v7x-class chip
        return 48 * _MIB, 3 * _MIB
    return 64 * _MIB, 4 * _MIB              # v5e / v6e (128 MiB physical)


def _auto_tile_h(N, H, WC, block_target):
    """Pick the H tile.

    Targets ~block_target-sized blocks (measured in f32-equivalent bytes so the
    in-kernel 32-bit intermediates stay bounded for narrow dtypes), uses a whole
    image per block (no halo DMAs) when it fits, and splits H into >=2 tiles when
    N==1 so both v7x TensorCores get a parallel grid step.
    """
    row_bytes32 = max(WC * 4, 1)
    th_cap = max(8, ((block_target // row_bytes32) // 8) * 8)
    if H <= th_cap:
        if N == 1 and H >= 16:
            return min(H, max(8, 8 * ((H + 15) // 16)))   # ~2 balanced tiles
        return H                                          # whole image, no halos
    return min(H, th_cap)


def _make_kernel(H, TH, WC, C, *, use_roll, has_halo, cdt, up_take=0, dn_take=0):
    """3x3 / stride-1 / pad-1 max pool on a (TH, W*C)-fused tile of an H-row image."""

    def _vertical(x, up_row, dn_row, grow, rid):
        neg = _pad_value(cdt)
        if use_roll:
            # Sublane rotates (XLU slot, ~free next to DMA) instead of concats.
            x_up = pltpu.roll(x, shift=1 % TH, axis=0)
            x_dn = pltpu.roll(x, shift=(TH - 1) % TH, axis=0)
            if has_halo:
                x_up = jnp.where(rid == 0, up_row, x_up)        # halo (or -inf at h==0)
                x_dn = jnp.where(rid == TH - 1, dn_row, x_dn)   # halo below tile
                x_dn = jnp.where(grow + 1 < H, x_dn, neg)       # image bottom + ragged rows
            else:
                x_up = jnp.where(grow > 0, x_up, neg)           # image top
                x_dn = jnp.where(grow + 1 < H, x_dn, neg)       # image bottom
        else:
            # Safe fallback for layouts the rotate path does not cover.
            if has_halo:
                x_up = jnp.concatenate([up_row, x[:TH - 1]], axis=0)
                x_dn = jnp.concatenate([x[1:], dn_row], axis=0)
                x_dn = jnp.where(grow + 1 < H, x_dn, neg)
            else:
                neg_row = jnp.full((1, WC), neg, cdt)
                x_up = jnp.concatenate([neg_row, x[:TH - 1]], axis=0)
                x_dn = jnp.concatenate([x[1:], neg_row], axis=0)
        return x_up, x_dn

    def _horizontal(m):
        # +-1 in W == +-C elements on the fused W*C axis.
        neg = _pad_value(cdt)
        if use_roll:
            cid = lax.broadcasted_iota(jnp.int32, (1, WC), 1)
            left = jnp.where(cid >= C, pltpu.roll(m, shift=C % WC, axis=1), neg)
            right = jnp.where(cid < WC - C,
                              pltpu.roll(m, shift=(WC - C) % WC, axis=1), neg)
        else:
            negcol = jnp.full((TH, C), neg, cdt)
            left = jnp.concatenate([negcol, m[:, :WC - C]], axis=1)
            right = jnp.concatenate([m[:, C:], negcol], axis=1)
        return left, right

    if has_halo:
        def kernel(x_ref, up_ref, dn_ref, o_ref):
            h = pl.program_id(1)
            neg = _pad_value(cdt)
            x = x_ref[0].astype(cdt)                              # (TH, WC)
            rid = lax.broadcasted_iota(jnp.int32, (TH, 1), 0)
            grow = h * TH + rid                                   # global row index
            # One-row halo above / below this tile; top halo becomes -inf at h==0
            # (cheap (1, WC) select instead of a full-tile border mask).
            up_row = up_ref[0][up_take:up_take + 1, :].astype(cdt)
            up_row = jnp.where(h == 0, neg, up_row)
            dn_row = dn_ref[0][dn_take:dn_take + 1, :].astype(cdt)
            x_up, x_dn = _vertical(x, up_row, dn_row, grow, rid)
            m = jnp.maximum(jnp.maximum(x, x_up), x_dn)
            left, right = _horizontal(m)
            o_ref[0] = jnp.maximum(jnp.maximum(m, left), right).astype(o_ref.dtype)
        return kernel

    def kernel(x_ref, o_ref):
        x = x_ref[0].astype(cdt)                                  # (H, WC)
        rid = lax.broadcasted_iota(jnp.int32, (TH, 1), 0)
        x_up, x_dn = _vertical(x, None, None, rid, rid)           # grow == rid (TH == H)
        m = jnp.maximum(jnp.maximum(x, x_up), x_dn)
        left, right = _horizontal(m)
        o_ref[0] = jnp.maximum(jnp.maximum(m, left), right).astype(o_ref.dtype)
    return kernel


def maxpool3x3_nhwc(x_nhwc, *, tile_h=None):
    """3x3, stride-1, pad-1 max pool over H, W of an NHWC array (Pallas TPU)."""
    N, H, W, C = x_nhwc.shape
    WC = W * C
    x = x_nhwc.reshape(N, H, WC)                   # free: W, C contiguous in NHWC

    vmem_limit, block_target = _chip_budget()

    if tile_h is None:
        TH = _auto_tile_h(N, H, WC, block_target)
    else:
        TH = max(1, min(int(tile_h), H))
        if TH < H:
            # Round to a sublane multiple instead of silently using a full-image
            # block (which could blow v7x's 64 MiB VMEM on large images).
            TH = min(H, max(8, (TH // 8) * 8))
    nh = pl.cdiv(H, TH)

    cdt = _compute_dtype(x.dtype)
    # Roll (XLU) fast path when the fused axis is vreg-aligned; concat fallback
    # otherwise (narrow dtypes are upcast to 32-bit so they keep the fast path).
    use_roll = (WC % 128 == 0) and (TH % 8 == 0) and (jnp.dtype(cdt).itemsize == 4)

    cost = pl.CostEstimate(
        flops=8 * N * H * WC,
        transcendentals=0,
        bytes_accessed=2 * N * H * WC * x.dtype.itemsize)

    if nh == 1:
        # No-halo path: whole image per block, grid over N (parallel), zero halo DMAs.
        kernel = _make_kernel(H, TH, WC, C, use_roll=use_roll, has_halo=False, cdt=cdt)
        out = pl.pallas_call(
            kernel,
            out_shape=jax.ShapeDtypeStruct((N, H, WC), x.dtype),
            grid_spec=pltpu.PrefetchScalarGridSpec(
                num_scalar_prefetch=0,
                grid=(N,),
                in_specs=[pl.BlockSpec((1, H, WC), lambda n: (n, 0, 0))],
                out_specs=pl.BlockSpec((1, H, WC), lambda n: (n, 0, 0)),
            ),
            compiler_params=pltpu.CompilerParams(
                dimension_semantics=("parallel",),
                vmem_limit_bytes=vmem_limit),
            cost_estimate=cost,
        )(x)
    else:
        # Halo path: H tiled for pipelining; 1-row halos come from two small
        # 8-row side inputs with clamped index maps.
        thb = TH // 8
        hb_total = pl.cdiv(H, 8)
        halo_rows, up_take, dn_take = 8, 7, 0
        up_map = lambda n, h: (n, jnp.maximum(h * thb - 1, 0), 0)
        dn_map = lambda n, h: (n, jnp.minimum((h + 1) * thb, hb_total - 1), 0)
        kernel = _make_kernel(H, TH, WC, C, use_roll=use_roll, has_halo=True,
                              cdt=cdt, up_take=up_take, dn_take=dn_take)
        out = pl.pallas_call(
            kernel,
            out_shape=jax.ShapeDtypeStruct((N, H, WC), x.dtype),
            grid_spec=pltpu.PrefetchScalarGridSpec(
                num_scalar_prefetch=0,
                grid=(N, nh),
                in_specs=[
                    pl.BlockSpec((1, TH, WC), lambda n, h: (n, h, 0)),
                    pl.BlockSpec((1, halo_rows, WC), up_map),
                    pl.BlockSpec((1, halo_rows, WC), dn_map),
                ],
                out_specs=pl.BlockSpec((1, TH, WC), lambda n, h: (n, h, 0)),
            ),
            compiler_params=pltpu.CompilerParams(
                dimension_semantics=("parallel", "parallel"),
                vmem_limit_bytes=vmem_limit),
            cost_estimate=cost,
        )(x, x, x)
    return out.reshape(N, H, W, C)


def heatmap_maxpool_and_permute(heatmap_nchw, paf_nchw, *, tile_h=None):
    """JAX/Pallas equivalent of HeatmapMaxpoolAndPermute.forward.

    Inputs are NCHW (PyTorch conv convention); outputs are NHWC, i.e. the
    permute([0, 2, 3, 1]) of the PyTorch module:
        [paf_nhwc, heatmap_nhwc, maxpool_heatmap_nhwc]
    """
    # These transposes ARE the module's permute([0, 2, 3, 1]).
    # TODO(synk): fold the heatmap NCHW->NHWC transpose into the Pallas kernel
    # (one NCHW read -> both NHWC outputs, saving one HBM pass) once the small-C
    # channel-interleave relayout lowers reliably in Mosaic.
    heatmap_nhwc = jnp.transpose(heatmap_nchw, (0, 2, 3, 1))
    paf_nhwc = jnp.transpose(paf_nchw, (0, 2, 3, 1))
    maxpool_nhwc = maxpool3x3_nhwc(heatmap_nhwc, tile_h=tile_h)
    return [paf_nhwc, heatmap_nhwc, maxpool_nhwc]


def _reference(heatmap_nchw, paf_nchw):
    """Pure-JAX reference matching the torch semantics."""
    hm = jnp.transpose(heatmap_nchw, (0, 2, 3, 1))
    paf = jnp.transpose(paf_nchw, (0, 2, 3, 1))
    if jnp.issubdtype(hm.dtype, jnp.floating):
        init = jnp.array(-jnp.inf, hm.dtype)
    else:
        init = jnp.array(jnp.iinfo(hm.dtype).min, hm.dtype)
    mp = lax.reduce_window(
        hm, init, lax.max,
        window_dimensions=(1, 3, 3, 1),
        window_strides=(1, 1, 1, 1),
        padding=((0, 0), (1, 1), (1, 1), (0, 0)))
    return [paf, hm, mp]


if __name__ == "__main__":
    key = jax.random.PRNGKey(0)
    k_hm, k_paf = jax.random.split(key)

    # Small NCHW inputs: heatmap (N=2, C=8, H=16, W=16), PAF (N=2, C=16, H=16, W=16).
    heatmap = jax.random.normal(k_hm, (2, 8, 16, 16), dtype=jnp.float32)
    paf = jax.random.normal(k_paf, (2, 16, 16, 16), dtype=jnp.float32)

    def check(hm, pf, tile_h, tol):
        refs = _reference(hm, pf)
        outs = heatmap_maxpool_and_permute(hm, pf, tile_h=tile_h)
        outs = [jax.block_until_ready(o) for o in outs]
        for o, r in zip(outs, refs):
            assert o.shape == r.shape and o.dtype == r.dtype
            assert jnp.allclose(o.astype(jnp.float32), r.astype(jnp.float32),
                                atol=tol, rtol=tol), (
                f"mismatch (tile_h={tile_h}, dtype={hm.dtype}, shape={hm.shape})")

    # 1) auto tiling: no-halo path (whole image per block), grid over N, roll path.
    check(heatmap, paf, None, 1e-6)
    # 2) forced H tiling: halo / pipelined path.
    check(heatmap, paf, 8, 1e-6)
    # 3) ragged H (H=20, tile_h=8): block-padding row masks + clamped halo maps.
    hm20 = jax.random.normal(k_hm, (1, 8, 20, 16), dtype=jnp.float32)
    pf20 = jax.random.normal(k_paf, (1, 4, 20, 16), dtype=jnp.float32)
    check(hm20, pf20, 8, 1e-6)
    # 4) N==1 auto path: H auto-split into 2 tiles so both v7x TensorCores get work.
    hm32 = jax.random.normal(k_hm, (1, 8, 32, 16), dtype=jnp.float32)
    pf32 = jax.random.normal(k_paf, (1, 4, 32, 16), dtype=jnp.float32)
    check(hm32, pf32, None, 1e-6)
    # 5) bf16: kernel upcasts to f32 internally (exact), keeps roll + lane-dense stores.
    check(heatmap.astype(jnp.bfloat16), paf.astype(jnp.bfloat16), None, 0.0)

    print("KERNEL_OK")
</pallas_src>

<mosaic_0001>
module attributes {stable_mosaic.version = 11 : i64} {
  func.func @kernel(%arg0: i32, %arg1: memref<1x16x128xf32, #tpu.memory_space<vmem>>, %arg2: memref<1x16x128xf32, #tpu.memory_space<vmem>>) attributes {dimension_semantics = [#tpu.dimension_semantics<parallel>], iteration_bounds = array<i64: 2>, scalar_prefetch = 0 : i64, scratch_operands = 0 : i64, tpu.core_type = #tpu.core_type<tc>, window_params = [{transform_indices = @transform_0, window_bounds = array<i64: 1, 16, 128>}, {transform_indices = @transform_1, window_bounds = array<i64: 1, 16, 128>}]} {
    %c0 = arith.constant 0 : index
    %c0_0 = arith.constant 0 : index
    %c0_1 = arith.constant 0 : index
    %0 = vector.load %arg1[%c0, %c0_0, %c0_1] : memref<1x16x128xf32, #tpu.memory_space<vmem>>, vector<1x16x128xf32>
    %1 = vector.shape_cast %0 : vector<1x16x128xf32> to vector<16x128xf32>
    %2 = tpu.iota {dimensions = array<i32: 0>} : vector<16x1xi32>
    %c1_i32 = arith.constant 1 : i32
    %3 = tpu.dynamic_rotate %1 by %c1_i32 dim 0 : vector<16x128xf32>, i32 -> vector<16x128xf32>
    %c15_i32 = arith.constant 15 : i32
    %4 = tpu.dynamic_rotate %1 by %c15_i32 dim 0 : vector<16x128xf32>, i32 -> vector<16x128xf32>
    %c0_i32 = arith.constant 0 : i32
    %5 = vector.broadcast %c0_i32 : i32 to vector<16x1xi32>
    %6 = arith.cmpi sgt, %2, %5 : vector<16x1xi32>
    %cst = arith.constant 0xFF800000 : f32
    %7 = vector.shape_cast %6 : vector<16x1xi1> to vector<16x1xi1>
    %8 = vector.broadcast %7 : vector<16x1xi1> to vector<16x128xi1>
    %9 = vector.broadcast %cst : f32 to vector<16x128xf32>
    %10 = arith.select %8, %3, %9 : vector<16x128xi1>, vector<16x128xf32>
    %c1_i32_2 = arith.constant 1 : i32
    %11 = vector.broadcast %c1_i32_2 : i32 to vector<16x1xi32>
    %12 = arith.addi %2, %11 : vector<16x1xi32>
    %c16_i32 = arith.constant 16 : i32
    %13 = vector.broadcast %c16_i32 : i32 to vector<16x1xi32>
    %14 = arith.cmpi slt, %12, %13 : vector<16x1xi32>
    %cst_3 = arith.constant 0xFF800000 : f32
    %15 = vector.shape_cast %14 : vector<16x1xi1> to vector<16x1xi1>
    %16 = vector.broadcast %15 : vector<16x1xi1> to vector<16x128xi1>
    %17 = vector.broadcast %cst_3 : f32 to vector<16x128xf32>
    %18 = arith.select %16, %4, %17 : vector<16x128xi1>, vector<16x128xf32>
    %19 = arith.maximumf %1, %10 : vector<16x128xf32>
    %20 = arith.maximumf %19, %18 : vector<16x128xf32>
    %21 = tpu.iota {dimensions = array<i32: 1>} : vector<1x128xi32>
    %c8_i32 = arith.constant 8 : i32
    %22 = vector.broadcast %c8_i32 : i32 to vector<1x128xi32>
    %23 = arith.cmpi sge, %21, %22 : vector<1x128xi32>
    %c8_i32_4 = arith.constant 8 : i32
    %24 = tpu.dynamic_rotate %20 by %c8_i32_4 dim 1 : vector<16x128xf32>, i32 -> vector<16x128xf32>
    %cst_5 = arith.constant 0xFF800000 : f32
    %25 = vector.shape_cast %23 : vector<1x128xi1> to vector<1x128xi1>
    %26 = vector.broadcast %25 : vector<1x128xi1> to vector<16x128xi1>
    %27 = vector.broadcast %cst_5 : f32 to vector<16x128xf32>
    %28 = arith.select %26, %24, %27 : vector<16x128xi1>, vector<16x128xf32>
    %c120_i32 = arith.constant 120 : i32
    %29 = vector.broadcast %c120_i32 : i32 to vector<1x128xi32>
    %30 = arith.cmpi slt, %21, %29 : vector<1x128xi32>
    %c120_i32_6 = arith.constant 120 : i32
    %31 = tpu.dynamic_rotate %20 by %c120_i32_6 dim 1 : vector<16x128xf32>, i32 -> vector<16x128xf32>
    %cst_7 = arith.constant 0xFF800000 : f32
    %32 = vector.shape_cast %30 : vector<1x128xi1> to vector<1x128xi1>
    %33 = vector.broadcast %32 : vector<1x128xi1> to vector<16x128xi1>
    %34 = vector.broadcast %cst_7 : f32 to vector<16x128xf32>
    %35 = arith.select %33, %31, %34 : vector<16x128xi1>, vector<16x128xf32>
    %36 = arith.maximumf %20, %28 : vector<16x128xf32>
    %37 = arith.maximumf %36, %35 : vector<16x128xf32>
    %c0_8 = arith.constant 0 : index
    %c0_9 = arith.constant 0 : index
    %c0_10 = arith.constant 0 : index
    %38 = vector.load %arg2[%c0_8, %c0_9, %c0_10] : memref<1x16x128xf32, #tpu.memory_space<vmem>>, vector<1x16x128xf32>
    %39 = vector.shape_cast %38 : vector<1x16x128xf32> to vector<16x128xf32>
    %40 = vector.shape_cast %37 : vector<16x128xf32> to vector<1x16x128xf32>
    tpu.vector_store %arg2[%c0_8, %c0_9, %c0_10], %40 {strides = array<i32>} : memref<1x16x128xf32, #tpu.memory_space<vmem>>, vector<1x16x128xf32>,
    return
  }
  func.func @transform_0(%arg0: i32) -> (i32, i32, i32) {
    %c0_i32 = arith.constant 0 : i32
    %c0_i32_0 = arith.constant 0 : i32
    %c0_i32_1 = arith.constant 0 : i32
    return %arg0, %c0_i32, %c0_i32_0 : i32, i32, i32
  }
  func.func @transform_1(%arg0: i32) -> (i32, i32, i32) {
    %c0_i32 = arith.constant 0 : i32
    %c0_i32_0 = arith.constant 0 : i32
    %c0_i32_1 = arith.constant 0 : i32
    return %arg0, %c0_i32, %c0_i32_0 : i32, i32, i32
  }
}

</mosaic_0001>

<bundles_post_ra>
// kernel: tpu_custom_call.1
= control target key start
LH: loop header
LB: loop body
LE: loop exit
PB: predicated region body
PF: predicated region fallthrough
CT: control target
= control target key end

     0   :  { %6 = vsyncpa [#allocation3], 0  ;;  %s636_s0 = inlined_call_operand.hbm [shape: f32[2,16,128], index: 0, kind: input, shape index: {}]   ;;  %s637_s1 = inlined_call_operand.hbm [shape: f32[2,16,128], index: 1, kind: output, shape index: {}]  }
   0x1   :  { %8 = vsyncpa [#allocation3 + $0x1], 0 }
   0x2   :  { %9 = vsyncpa [#allocation4], 0 }
   0x3   :  { %11 = vsyncpa [#allocation4 + $0x1], 0  ;;  %s467_s6 = smov 0   ;;  %s469_s7 = smov 0  }
   0x4   :  { %s471_s8 = smov 0   ;;  %s473_s9 = smov 0  }
   0x5 LB: > { %s488_s10 = sadd.s32 4294967295, %s448_s9   ;;  %s285_s11 = sadd.s32 4294967294, %s448_s9   ;;  %s448_s9 = sphi %s473_s9, %s650_s9   ;;  %s444_s8 = sphi %s471_s8, %s649_s8   ;;  %s440_s7 = sphi %s469_s7, %s648_s7   ;;  %s436_s6 = sphi %s467_s6, %s647_s6  }
   0x6   : > { %s492_s12 = sadd.s32 1, %s448_s9   ;;  %s24_s13 = sadd.s32 1, %s444_s8 }
   0x7   : > { %s21_s14 = ssub.s32 %s448_s9, %s492_s12  ;;  %p31_p0 = scmp.ne.s32.totalorder %s444_s8, %s440_s7 }
   0x8   : > { %p22_p1 = scmp.eq.s32.totalorder %s21_s14, 0  ;;  %p32_p2 = scmp.eq.s32.totalorder %s448_s9, 0 }
   0x9   : > { %p37_p3 = scmp.ne.s32.totalorder %s440_s7, %s436_s6  ;;  %p38_p4 = scmp.eq.s32.totalorder %s488_s10, 0 }
   0xa   : > { %s504_s15 = scalar_select %p22_p1, %s444_s8, %s24_s13  }
   0xb   : > { %p506_p5 = por %p32_p2, %p31_p0  ;;  %p510_p6 = por %p38_p4, %p37_p3 }
   0xc   : > { %p61_p7 = scmp.eq.s32.totalorder %s488_s10, 1  ;;  %p67_p8 = scmp.eq.s32.totalorder %s285_s11, 1 }
   0xd   : > { %p313_p10 = scmp.lt.s32.totalorder %s448_s9, 2  ;;  %s87_s20 = sand.u32 1, %s444_s8  }
   0xe   : > { %p517_p11 = por %p61_p7, %p31_p0  ;;  %p521_p12 = por %p67_p8, %p37_p3 }
   0xf   : > { %s299_s21 = sshll.u32 %s448_s9, 8  ;;  %s288_s22 = sshll.u32 %s87_s20, 4 }
  0x10   : > { %s641_s18 = scalar_select %p517_p11, 1, 0 }
  0x11   : > { %s642_s19 = scalar_select %p521_p12, 1, 0 }
  0x12   : > { %s530_s25 = scalar_lea.hbm %s636_s0, %s299_s21  ;;  %s91_s26 = scalar_lea.vmem [#allocation2], %s288_s22 }
  0x13   : > { %s98_s27 = sshll.u32 %s91_s26, 4  ;;  %p534_p13 = pnand %p313_p10, %p506_p5  ;;  %s538_s27 = int_to_ptr.vmem [resolvable:$true] %s98_s27 }
  0x14   : > { %s540_s29 = scalar_lea.sflag [#allocation3], %s87_s20  ;;  %s352_s30 = scalar_lea.hbm %s530_s25, 256 }
  0x15   : > { %p353_p0 = scmp.ne.s32.totalorder %s530_s25, %s352_s30  ;;  %p354_p1 = pneg %p534_p13 }
  0x16   : > { %s357_s4 = scalar_lea.hbm %s636_s0, 512  ;;  %p358_p4 = scmp.lt.u32.totalorder %s530_s25, %s636_s0 }
  0x17   : > { %p355_p2 = pnand %p354_p1, %p353_p0  ;;  %p359_p5 = scmp.lt.u32.totalorder %s357_s4, %s352_s30 }
  0x18   : > { %p361_p8 = scmp.lt.u32.totalorder %s352_s30, %s530_s25 }
  0x19   : > { %p356_p3 = pneg %p355_p2  ;;  %p360_p7 = por %p359_p5, %p358_p4 }
  0x1b   : > { %p362_p10 = por %p361_p8, %p360_p7 }
  0x1d   : > { %p363_p9 = pnand %p362_p10, %p356_p3 }
  0x1f   : > { %366 = shalt.err (!%p363_p9)
}
  0x20   : > { %s367_s13 = scalar_lea.vmem %s538_s27, 256  ;;  %s450_s14 = smov [#allocation2]  }
  0x21   : > { %p368_p0 = scmp.ne.s32.totalorder %s538_s27, %s367_s13  ;;  %s372_s16 = sshll.u32 %s450_s14, 4  ;;  %s373_s16 = int_to_ptr.vmem [resolvable:$false] %s372_s16 }
  0x22   : > { %s374_s20 = scalar_lea.vmem %s373_s16, 512  ;;  %p375_p11 = scmp.lt.s32.totalorder %s538_s27, %s373_s16 }
  0x23   : > { %p370_p2 = pnand %p368_p0, %p354_p1  ;;  %p376_p4 = scmp.lt.s32.totalorder %s374_s20, %s367_s13 }
  0x25   : > { %p371_p12 = pneg %p370_p2  ;;  %p377_p5 = por %p376_p4, %p375_p11 }
  0x27   : > { %p378_p7 = pnand %p377_p5, %p371_p12 }
  0x29   : > { %381 = shalt.err (!%p378_p7)
}
  0x2a   : > { %s451_s21 = smov 128   ;;  %s452_s22 = smov 8  }
  0x2b   : > { %308 = dma.hbm_to_vmem [thread:$0]  (!%p534_p13), %s530_s25, 256, %s538_s27, %s540_s29, %s451_s21, %s451_s21, %s452_s22  }
  0x2c   : > { %p291_p9 = scmp.ge.s32.totalorder %s448_s9, 1  ;;  %p106_p1 = scmp.lt.s32.totalorder %s448_s9, 3 }
  0x2e   : > { %p107_p3 = pnand %p291_p9, %p106_p1 }
  0x2f   : > { %s571_s23 = sand.u32 (!%p107_p3), 1, %s440_s7  }
  0x30   : > { %110 = sbr.rel (%p107_p3) target bundleno = 206 (0xce), region = 24  ;;  %s292_s24 = sshll.u32 (!%p107_p3), %s571_s23, 4 }
  0x31   : > { %s113_s26 = scalar_lea.sflag (!%p107_p3), [#allocation3], %s571_s23  ;;  %s116_s30 = scalar_lea.vmem (!%p107_p3), [#allocation2], %s292_s24 }
  0x37   : > { %427 = dma.done.wait (%p510_p6), %s113_s26, 256  }
  0x38   : > { %429 = vsyncadd (%p510_p6), %s113_s26, 4294967040  ;;  %v137_v0 = vlaneseq  ;;  %v135_v4 = vld [vmem:[%s116_s30] sm:$0xff]  ;;  %v136_v5 = vld [vmem:[%s116_s30 + $0x8] sm:$0xff]  ;;  %s453_s17 = smov 8   ;;  %s454_s25 = smov 120  }
  0x39   : > { %v140_v6 = vrot.slane %v135_v4, 7  ;;  %v141_v7 = vrot.slane %v136_v5, 7  ;;  %v145_v8 = vrot.slane %v135_v4, 1  ;;  %v146_v9 = vrot.slane %v136_v5, 1  ;;  %s134_s27 = scalar_lea.vmem [#allocation5], %s292_s24  ;;  %s300_s29 = sshll.u32 %s488_s10, 8 }
  0x3a   : > { %v138_v1 = vshrl.u32 %v137_v0, 7  ;;  %v173_v20 = vand.u32 127, %v137_v0  ;;  %s212_s28 = sshll.u32 %s134_s27, 4  ;;  %s591_s4 = scalar_lea.hbm %s637_s1, %s300_s29  ;;  %s586_s28 = int_to_ptr.vmem [resolvable:$true] %s212_s28 }
  0x3b   : > { %s199_s5 = scalar_lea.sflag [#allocation4], %s571_s23  ;;  %s382_s11 = scalar_lea.vmem %s586_s28, 256 }
  0x3c   : > { %v139_v2 = vadd.s32 8, %v138_v1  ;;  %vm142_vm0 = vcmp.lt.s32.totalorder %v138_v1, 1  ;;  %vm147_vm1 = vcmp.lt.s32.totalorder %v138_v1, 7  ;;  %vm150_vm2 = vcmp.gt.s32.totalorder %v138_v1, 0  ;;  %p383_p6 = scmp.ne.s32.totalorder %s586_s28, %s382_s11  ;;  %p644_p11 = scmp.ne.s32.totalorder %s641_s18, 0 }
  0x3d   : > { %v144_v10 = vsel %vm142_vm0, %v141_v7, %v140_v6  ;;  %v143_v11 = vsel %vm142_vm0, %v140_v6, %v141_v7  ;;  %v149_v12 = vsel %vm147_vm1, %v146_v9, %v145_v8  ;;  %v148_v13 = vsel %vm147_vm1, %v145_v8, %v146_v9  ;;  %s455_s10 = smov [#allocation5]  }
  0x3e   : > { %v159_v3 = vadd.s32 1, %v139_v2  ;;  %v156_v14 = vsel %vm150_vm2, %v144_v10, -inf  ;;  %v169_v16 = vmax.f32 %v136_v5, %v143_v11  ;;  %vm174_vm4 = vcmp.ge.s32.totalorder %v173_v20, 8  ;;  %p384_p12 = pnand %p383_p6, %p644_p11  ;;  %s386_s13 = sshll.u32 %s455_s10, 4  ;;  %s387_s13 = int_to_ptr.vmem [resolvable:$false] %s386_s13 }
  0x3f   : > { %v168_v15 = vmax.f32 %v135_v4, %v156_v14  ;;  %vm183_vm5 = vcmp.lt.s32.totalorder %v173_v20, 120  ;;  %s388_s14 = scalar_lea.vmem %s387_s13, 512  ;;  %p389_p8 = scmp.lt.s32.totalorder %s586_s28, %s387_s13 }
  0x40   : > { %vm161_vm3 = vcmp.lt.s32.totalorder %v159_v3, 16  ;;  %p385_p13 = pneg %p384_p12  ;;  %p390_p10 = scmp.lt.s32.totalorder %s388_s14, %s382_s11 }
  0x41   : > { %v167_v17 = vsel %vm161_vm3, %v149_v12, -inf  ;;  %v170_v18 = vmax.f32 %v168_v15, %v148_v13 }
  0x42   : > { %v171_v19 = vmax.f32 %v169_v16, %v167_v17  ;;  %p391_p0 = por %p390_p10, %p389_p8 }
  0x43   : > { %175 = vrot.lane.b32.xlu0 %v170_v18, %s453_s17  ;;  %184 = vrot.lane.b32.xlu1 %v170_v18, %s454_s25 }
  0x44   : > { %p392_p2 = pnand %p391_p0, %p385_p13 }
  0x47   : > { %177 = vrot.lane.b32.xlu0 %v171_v19, %s453_s17  ;;  %186 = vrot.lane.b32.xlu1 %v171_v19, %s454_s25 }
  0xb5   : > { %v176_v21 = vpop.permute.xlu0 %175  ;;  %v185_v22 = vpop.permute.xlu1 %184 }
  0xb6   : > { %v181_v23 = vsel %vm174_vm4, %v176_v21, -inf  ;;  %v190_v24 = vsel %vm183_vm5, %v185_v22, -inf }
  0xb7   : > { %v192_v25 = vmax.f32 %v170_v18, %v181_v23 }
  0xb9   : > { %v194_v26 = vmax.f32 %v192_v25, %v190_v24  ;;  %v178_v27 = vpop.permute.xlu0 %177  ;;  %v187_v28 = vpop.permute.xlu1 %186 }
  0xba   : > { %v182_v29 = vsel %vm174_vm4, %v178_v27, -inf  ;;  %v191_v30 = vsel %vm183_vm5, %v187_v28, -inf }
  0xbb   : > { %196 = vst [vmem:[%s134_s27] sm:$0xff] %v194_v26  ;;  %v193_v31 = vmax.f32 %v171_v19, %v182_v29 }
  0xbd   : > { %v195_v32 = vmax.f32 %v193_v31, %v191_v30 }
  0xbf   : > { %197 = vst [vmem:[%s134_s27 + $0x8] sm:$0xff] %v195_v32 }
  0xc0   : > { %395 = shalt.err (!%p392_p2)
}
  0xc1   : > { %s396_s16 = scalar_lea.hbm %s591_s4, 256  ;;  %s400_s22 = scalar_lea.hbm %s637_s1, 512 }
  0xc2   : > { %p397_p4 = scmp.ne.s32.totalorder %s591_s4, %s396_s16  ;;  %p401_p9 = scmp.lt.u32.totalorder %s591_s4, %s637_s1 }
  0xc3   : > { %p402_p1 = scmp.lt.u32.totalorder %s400_s22, %s396_s16  ;;  %p404_p6 = scmp.lt.u32.totalorder %s396_s16, %s591_s4 }
  0xc4   : > { %p398_p5 = pnand %p397_p4, %p644_p11 }
  0xc5   : > { %p403_p3 = por %p402_p1, %p401_p9 }
  0xc6   : > { %p399_p7 = pneg %p398_p5 }
  0xc7   : > { %p405_p12 = por %p404_p6, %p403_p3 }
  0xc9   : > { %p406_p13 = pnand %p405_p12, %p399_p7 }
  0xcb   : > { %409 = shalt.err (!%p406_p13)
}
  0xcc   : > { %s456_s30 = smov 128  }
  0xcd   : > { %303 = dma.vmem_to_hbm [thread:$0]  (%p644_p11), %s586_s28, 256, %s591_s4, %s199_s5, %s456_s30, %s456_s30, %s453_s17  }
  0xce PF: > { %s227_s25 = sand.u32 1, %s436_s6   ;;  %p645_p8 = scmp.ne.s32.totalorder %s642_s19, 0 }
  0xcf   : > { %p646_p10 = scmp.ge.s32.totalorder %s448_s9, 2  ;;  %s228_s27 = scalar_lea.sflag [#allocation4], %s227_s25 }
  0xd1   : > { %p310_p0 = pnand %p646_p10, %p645_p8 }
  0xd3   : > { %431 = dma.done.wait (!%p310_p0), %s228_s27, 256  }
  0xd4   : > { %433 = vsyncadd (!%p310_p0), %s228_s27, 4294967040  ;;  %p14_p2 = scmp.ge.s32.totalorder %s492_s12, 4   ;;  %s647_s6 = smov %s440_s7 }
  0xd5   : > { %s648_s7 = smov %s444_s8  ;;  %s649_s8 = smov %s504_s15 }
  0xd6   : > { %s650_s9 = smov %s492_s12  ;;  %16 = sbr.rel (!%p14_p2) target bundleno = 5 (0x5), region = 69 }
  0xdd   :  { %233 = vsyncpa [#allocation3], 1 }
  0xde   :  { %235 = vsyncpa [#allocation3 + $0x1], 1 }
  0xdf   :  { %236 = vsyncpa [#allocation4], 1 }
  0xe0   :  { %238 = vsyncpa [#allocation4 + $0x1], 1 }

</bundles_post_ra>
